<compile_context>
chip_gen: v7x
topology: tpu7x:2x2x1
jax: 0.10.0
libtpu: 0.0.40
codegen_flags: <defaults>
</compile_context>

<pallas_src>
import functools

import jax
import jax.numpy as jnp
from jax.experimental import pallas as pl
from jax.experimental.pallas import tpu as pltpu

# Logical (PyTorch) layer widths and their lane-padded (multiple-of-128) versions.
_DIMS = [600, 150, 64, 100, 128]
_PADDED = [600, 256, 128, 128, 128]  # input stays 600 (full-dim block is legal)


def _round_up(x, m):
    return (x + m - 1) // m * m


def read_model_kernel(x_ref,
                      w1_ref, b1_ref,
                      w2_ref, b2_ref,
                      w3_ref, b3_ref,
                      w4_ref, b4_ref,
                      o_ref):
    """Fused 4x (x @ W + b).relu(): bf16 MXU operands, f32 accumulation."""

    def layer(h, w_ref, b_ref):
        acc = jnp.dot(h, w_ref[...], preferred_element_type=jnp.float32)
        return jnp.maximum(acc + b_ref[...], 0.0)          # bias + ReLU in f32

    # In-kernel cast: x arrives as f32 (or bf16) straight from HBM; no extra
    # wrapper-side cast pass.  No-op if the producer already handed us bf16.
    x = x_ref[...].astype(jnp.bfloat16)                              # (TB, 600)
    h = layer(x, w1_ref, b1_ref).astype(jnp.bfloat16)                # (TB, 256)
    h = layer(h, w2_ref, b2_ref).astype(jnp.bfloat16)                # (TB, 128)
    h = layer(h, w3_ref, b3_ref).astype(jnp.bfloat16)                # (TB, 128)
    o_ref[...] = layer(h, w4_ref, b4_ref).astype(o_ref.dtype)        # (TB, 128)


def _choose_tile_b(B, tile_b):
    """Batch tile: multiple of 8, <= tile_b, and sized so the grid has ~>=4
    steps when B allows it (lets the 'parallel' axis shard across both v7x
    TensorCores instead of collapsing to a single step)."""
    target = _round_up(pl.cdiv(B, 4), 8)
    return max(8, min(tile_b, target))


def read_model_forward(x, prepared, *, tile_b=1024, out_dtype=jnp.float32):
    """x: (B, 600) f32 (bf16 also accepted).  prepared: lane-padded params.
    Returns (B, 128) out_dtype."""
    B = x.shape[0]
    w1, b1 = prepared["w1"], prepared["b1"]
    w2, b2 = prepared["w2"], prepared["b2"]
    w3, b3 = prepared["w3"], prepared["b3"]
    w4, b4 = prepared["w4"], prepared["b4"]

    TB = _choose_tile_b(B, tile_b)
    grid = (pl.cdiv(B, TB),)   # ragged last block handled by Pallas masking

    def const_spec(shape):
        return pl.BlockSpec(shape, lambda i: (0, 0))  # VMEM-resident across steps

    out = pl.pallas_call(
        read_model_kernel,
        out_shape=jax.ShapeDtypeStruct((B, 128), out_dtype),
        grid=grid,
        in_specs=[
            pl.BlockSpec((TB, 600), lambda i: (i, 0)),   # x tile, dtype as given
            const_spec(w1.shape), const_spec(b1.shape),
            const_spec(w2.shape), const_spec(b2.shape),
            const_spec(w3.shape), const_spec(b3.shape),
            const_spec(w4.shape), const_spec(b4.shape),
        ],
        out_specs=pl.BlockSpec((TB, 128), lambda i: (i, 0)),
        compiler_params=pltpu.CompilerParams(
            dimension_semantics=("parallel",),       # megacore batch sharding (v7x)
            vmem_limit_bytes=32 * 1024 * 1024,       # ~<8 MB used at TB=1024 incl. double buffering
        ),
    )(x, w1, b1, w2, b2, w3, b3, w4, b4)

    return out


def init_params(key):
    """PyTorch nn.Linear-style init (uniform(-k, k), k=1/sqrt(fan_in)), f32, unpadded."""
    params = {}
    for i in range(1, 5):
        fan_in, fan_out = _DIMS[i - 1], _DIMS[i]
        key, kw, kb = jax.random.split(key, 3)
        bound = float(fan_in) ** -0.5
        params[f"w{i}"] = jax.random.uniform(
            kw, (fan_in, fan_out), jnp.float32, -bound, bound)
        # biases kept 2D (1, fan_out) for clean TPU vreg layout; broadcast over batch.
        params[f"b{i}"] = jax.random.uniform(
            kb, (1, fan_out), jnp.float32, -bound, bound)
    return params


def prepare_params(params):
    """One-time preprocessing: zero-pad hidden dims to lane multiples, cast weights to bf16."""
    prepared = {}
    for i in range(1, 5):
        in_p, out_p = _PADDED[i - 1], _PADDED[i]
        w, b = params[f"w{i}"], params[f"b{i}"]
        w = jnp.pad(w, ((0, in_p - w.shape[0]), (0, out_p - w.shape[1])))
        b = jnp.pad(b, ((0, 0), (0, out_p - b.shape[1])))
        prepared[f"w{i}"] = w.astype(jnp.bfloat16)
        prepared[f"b{i}"] = b.astype(jnp.float32)
    return prepared


def reference_forward(x, params):
    """Original f32 semantics (matches the PyTorch module)."""
    h = x
    for i in range(1, 5):
        h = jnp.maximum(h @ params[f"w{i}"] + params[f"b{i}"], 0.0)
    return h


def reference_forward_bf16(x, prepared):
    """Precision-matched reference (bf16 operands, f32 accumulation)."""
    h = x.astype(jnp.bfloat16)
    acc = None
    for i in range(1, 5):
        acc = jnp.dot(h, prepared[f"w{i}"], preferred_element_type=jnp.float32)
        acc = jnp.maximum(acc + prepared[f"b{i}"], 0.0)
        h = acc.astype(jnp.bfloat16)
    return acc


if __name__ == "__main__":
    key = jax.random.PRNGKey(0)
    key, kx1, kx2 = jax.random.split(key, 3)
    params = init_params(key)
    prepared = prepare_params(params)

    fwd = jax.jit(functools.partial(read_model_forward, tile_b=1024))

    # Case 1: small, tile-aligned batch.
    B1 = 8
    x1 = jax.random.normal(kx1, (B1, 600), jnp.float32)
    out1 = jax.block_until_ready(fwd(x1, prepared))
    assert out1.shape == (B1, 128), out1.shape
    ref1_bf16 = reference_forward_bf16(x1, prepared)
    assert jnp.allclose(out1, ref1_bf16, atol=2e-3, rtol=2e-3), "mismatch vs bf16 reference (B=8)"
    ref1_f32 = reference_forward(x1, params)
    # bf16 MXU operands are an intentional precision trade-off vs the f32 module.
    assert jnp.allclose(out1, ref1_f32, atol=1e-1, rtol=1e-1), "mismatch vs f32 reference (B=8)"

    # Case 2: ragged batch (B not a multiple of the tile) exercises the
    # cdiv grid + Pallas masking of the last block.
    B2 = 20
    x2 = jax.random.normal(kx2, (B2, 600), jnp.float32)
    out2 = jax.block_until_ready(fwd(x2, prepared))
    assert out2.shape == (B2, 128), out2.shape
    ref2_bf16 = reference_forward_bf16(x2, prepared)
    assert jnp.allclose(out2, ref2_bf16, atol=2e-3, rtol=2e-3), "mismatch vs bf16 reference (B=20)"

    print("KERNEL_OK")
</pallas_src>

<mosaic_0001>
module attributes {stable_mosaic.version = 11 : i64} {
  func.func @read_model_kernel(%arg0: i32, %arg1: memref<8x600xf32, #tpu.memory_space<vmem>>, %arg2: memref<600x256xbf16, #tpu.memory_space<vmem>>, %arg3: memref<1x256xf32, #tpu.memory_space<vmem>>, %arg4: memref<256x128xbf16, #tpu.memory_space<vmem>>, %arg5: memref<1x128xf32, #tpu.memory_space<vmem>>, %arg6: memref<128x128xbf16, #tpu.memory_space<vmem>>, %arg7: memref<1x128xf32, #tpu.memory_space<vmem>>, %arg8: memref<128x128xbf16, #tpu.memory_space<vmem>>, %arg9: memref<1x128xf32, #tpu.memory_space<vmem>>, %arg10: memref<8x128xf32, #tpu.memory_space<vmem>>) attributes {dimension_semantics = [#tpu.dimension_semantics<parallel>], iteration_bounds = array<i64: 1>, scalar_prefetch = 0 : i64, scratch_operands = 0 : i64, tpu.core_type = #tpu.core_type<tc>, window_params = [{transform_indices = @transform_0, window_bounds = array<i64: 8, 600>}, {pipeline_mode = #tpu.pipeline_mode<synchronous>, transform_indices = @transform_1, window_bounds = array<i64: 600, 256>}, {pipeline_mode = #tpu.pipeline_mode<synchronous>, transform_indices = @transform_2, window_bounds = array<i64: 1, 256>}, {pipeline_mode = #tpu.pipeline_mode<synchronous>, transform_indices = @transform_3, window_bounds = array<i64: 256, 128>}, {pipeline_mode = #tpu.pipeline_mode<synchronous>, transform_indices = @transform_4, window_bounds = array<i64: 1, 128>}, {pipeline_mode = #tpu.pipeline_mode<synchronous>, transform_indices = @transform_5, window_bounds = array<i64: 128, 128>}, {pipeline_mode = #tpu.pipeline_mode<synchronous>, transform_indices = @transform_6, window_bounds = array<i64: 1, 128>}, {pipeline_mode = #tpu.pipeline_mode<synchronous>, transform_indices = @transform_7, window_bounds = array<i64: 128, 128>}, {pipeline_mode = #tpu.pipeline_mode<synchronous>, transform_indices = @transform_8, window_bounds = array<i64: 1, 128>}, {transform_indices = @transform_9, window_bounds = array<i64: 8, 128>}]} {
    %c0 = arith.constant 0 : index
    %c0_0 = arith.constant 0 : index
    %0 = vector.load %arg1[%c0, %c0_0] : memref<8x600xf32, #tpu.memory_space<vmem>>, vector<8x600xf32>
    %1 = arith.truncf %0 : vector<8x600xf32> to vector<8x600xbf16>
    %c0_1 = arith.constant 0 : index
    %c0_2 = arith.constant 0 : index
    %2 = vector.load %arg2[%c0_1, %c0_2] : memref<600x256xbf16, #tpu.memory_space<vmem>>, vector<600x256xbf16>
    %cst = arith.constant dense<0.000000e+00> : vector<8x256xf32>
    %3 = tpu.matmul %1, %2, %cst {dimension_numbers = #tpu.dot_dimension_numbers<[1], [0], [0], [1], [0, 0, 1, 1], [], []>} : vector<8x600xbf16>, vector<600x256xbf16>, vector<8x256xf32> -> vector<8x256xf32>
    %c0_3 = arith.constant 0 : index
    %c0_4 = arith.constant 0 : index
    %4 = vector.load %arg3[%c0_3, %c0_4] : memref<1x256xf32, #tpu.memory_space<vmem>>, vector<1x256xf32>
    %5 = vector.broadcast %4 : vector<1x256xf32> to vector<8x256xf32>
    %6 = arith.addf %3, %5 : vector<8x256xf32>
    %cst_5 = arith.constant 0.000000e+00 : f32
    %7 = vector.broadcast %cst_5 : f32 to vector<8x256xf32>
    %8 = arith.maximumf %6, %7 : vector<8x256xf32>
    %9 = arith.truncf %8 : vector<8x256xf32> to vector<8x256xbf16>
    %c0_6 = arith.constant 0 : index
    %c0_7 = arith.constant 0 : index
    %10 = vector.load %arg4[%c0_6, %c0_7] : memref<256x128xbf16, #tpu.memory_space<vmem>>, vector<256x128xbf16>
    %cst_8 = arith.constant dense<0.000000e+00> : vector<8x128xf32>
    %11 = tpu.matmul %9, %10, %cst_8 {dimension_numbers = #tpu.dot_dimension_numbers<[1], [0], [0], [1], [0, 0, 1, 1], [], []>} : vector<8x256xbf16>, vector<256x128xbf16>, vector<8x128xf32> -> vector<8x128xf32>
    %c0_9 = arith.constant 0 : index
    %c0_10 = arith.constant 0 : index
    %12 = vector.load %arg5[%c0_9, %c0_10] : memref<1x128xf32, #tpu.memory_space<vmem>>, vector<1x128xf32>
    %13 = vector.broadcast %12 : vector<1x128xf32> to vector<8x128xf32>
    %14 = arith.addf %11, %13 : vector<8x128xf32>
    %cst_11 = arith.constant 0.000000e+00 : f32
    %15 = vector.broadcast %cst_11 : f32 to vector<8x128xf32>
    %16 = arith.maximumf %14, %15 : vector<8x128xf32>
    %17 = arith.truncf %16 : vector<8x128xf32> to vector<8x128xbf16>
    %c0_12 = arith.constant 0 : index
    %c0_13 = arith.constant 0 : index
    %18 = vector.load %arg6[%c0_12, %c0_13] : memref<128x128xbf16, #tpu.memory_space<vmem>>, vector<128x128xbf16>
    %cst_14 = arith.constant dense<0.000000e+00> : vector<8x128xf32>
    %19 = tpu.matmul %17, %18, %cst_14 {dimension_numbers = #tpu.dot_dimension_numbers<[1], [0], [0], [1], [0, 0, 1, 1], [], []>} : vector<8x128xbf16>, vector<128x128xbf16>, vector<8x128xf32> -> vector<8x128xf32>
    %c0_15 = arith.constant 0 : index
    %c0_16 = arith.constant 0 : index
    %20 = vector.load %arg7[%c0_15, %c0_16] : memref<1x128xf32, #tpu.memory_space<vmem>>, vector<1x128xf32>
    %21 = vector.broadcast %20 : vector<1x128xf32> to vector<8x128xf32>
    %22 = arith.addf %19, %21 : vector<8x128xf32>
    %cst_17 = arith.constant 0.000000e+00 : f32
    %23 = vector.broadcast %cst_17 : f32 to vector<8x128xf32>
    %24 = arith.maximumf %22, %23 : vector<8x128xf32>
    %25 = arith.truncf %24 : vector<8x128xf32> to vector<8x128xbf16>
    %c0_18 = arith.constant 0 : index
    %c0_19 = arith.constant 0 : index
    %26 = vector.load %arg8[%c0_18, %c0_19] : memref<128x128xbf16, #tpu.memory_space<vmem>>, vector<128x128xbf16>
    %cst_20 = arith.constant dense<0.000000e+00> : vector<8x128xf32>
    %27 = tpu.matmul %25, %26, %cst_20 {dimension_numbers = #tpu.dot_dimension_numbers<[1], [0], [0], [1], [0, 0, 1, 1], [], []>} : vector<8x128xbf16>, vector<128x128xbf16>, vector<8x128xf32> -> vector<8x128xf32>
    %c0_21 = arith.constant 0 : index
    %c0_22 = arith.constant 0 : index
    %28 = vector.load %arg9[%c0_21, %c0_22] : memref<1x128xf32, #tpu.memory_space<vmem>>, vector<1x128xf32>
    %29 = vector.broadcast %28 : vector<1x128xf32> to vector<8x128xf32>
    %30 = arith.addf %27, %29 : vector<8x128xf32>
    %cst_23 = arith.constant 0.000000e+00 : f32
    %31 = vector.broadcast %cst_23 : f32 to vector<8x128xf32>
    %32 = arith.maximumf %30, %31 : vector<8x128xf32>
    %c0_24 = arith.constant 0 : index
    %c0_25 = arith.constant 0 : index
    %33 = vector.load %arg10[%c0_24, %c0_25] : memref<8x128xf32, #tpu.memory_space<vmem>>, vector<8x128xf32>
    tpu.vector_store %arg10[%c0_24, %c0_25], %32 {strides = array<i32>} : memref<8x128xf32, #tpu.memory_space<vmem>>, vector<8x128xf32>,
    return
  }
  func.func @transform_0(%arg0: i32) -> (i32, i32) {
    %c0_i32 = arith.constant 0 : i32
    %c0_i32_0 = arith.constant 0 : i32
    return %arg0, %c0_i32 : i32, i32
  }
  func.func @transform_1(%arg0: i32) -> (i32, i32) {
    %c0_i32 = arith.constant 0 : i32
    %c0_i32_0 = arith.constant 0 : i32
    %c0_i32_1 = arith.constant 0 : i32
    return %c0_i32, %c0_i32_0 : i32, i32
  }
  func.func @transform_2(%arg0: i32) -> (i32, i32) {
    %c0_i32 = arith.constant 0 : i32
    %c0_i32_0 = arith.constant 0 : i32
    %c0_i32_1 = arith.constant 0 : i32
    return %c0_i32, %c0_i32_0 : i32, i32
  }
  func.func @transform_3(%arg0: i32) -> (i32, i32) {
    %c0_i32 = arith.constant 0 : i32
    %c0_i32_0 = arith.constant 0 : i32
    %c0_i32_1 = arith.constant 0 : i32
    return %c0_i32, %c0_i32_0 : i32, i32
  }
  func.func @transform_4(%arg0: i32) -> (i32, i32) {
    %c0_i32 = arith.constant 0 : i32
    %c0_i32_0 = arith.constant 0 : i32
    %c0_i32_1 = arith.constant 0 : i32
    return %c0_i32, %c0_i32_0 : i32, i32
  }
  func.func @transform_5(%arg0: i32) -> (i32, i32) {
    %c0_i32 = arith.constant 0 : i32
    %c0_i32_0 = arith.constant 0 : i32
    %c0_i32_1 = arith.constant 0 : i32
    return %c0_i32, %c0_i32_0 : i32, i32
  }
  func.func @transform_6(%arg0: i32) -> (i32, i32) {
    %c0_i32 = arith.constant 0 : i32
    %c0_i32_0 = arith.constant 0 : i32
    %c0_i32_1 = arith.constant 0 : i32
    return %c0_i32, %c0_i32_0 : i32, i32
  }
  func.func @transform_7(%arg0: i32) -> (i32, i32) {
    %c0_i32 = arith.constant 0 : i32
    %c0_i32_0 = arith.constant 0 : i32
    %c0_i32_1 = arith.constant 0 : i32
    return %c0_i32, %c0_i32_0 : i32, i32
  }
  func.func @transform_8(%arg0: i32) -> (i32, i32) {
    %c0_i32 = arith.constant 0 : i32
    %c0_i32_0 = arith.constant 0 : i32
    %c0_i32_1 = arith.constant 0 : i32
    return %c0_i32, %c0_i32_0 : i32, i32
  }
  func.func @transform_9(%arg0: i32) -> (i32, i32) {
    %c0_i32 = arith.constant 0 : i32
    %c0_i32_0 = arith.constant 0 : i32
    return %arg0, %c0_i32 : i32, i32
  }
}

</mosaic_0001>

<bundles_post_ra>
// kernel: read_model_forward.1
= control target key start
LH: loop header
LB: loop body
LE: loop exit
PB: predicated region body
PF: predicated region fallthrough
CT: control target
= control target key end

     0   :  { %14 = vsyncpa [#allocation3], 0  ;;  %s1805_s0 = inlined_call_operand.hbm [shape: f32[8,600], index: 0, kind: input, shape index: {}]   ;;  %s1806_s1 = inlined_call_operand.hbm [shape: bf16[600,256], index: 1, kind: input, shape index: {}]   ;;  %s1807_s2 = inlined_call_operand.vmem [shape: f32[1,256], index: 2, kind: input, shape index: {}]   ;;  %s1808_s3 = inlined_call_operand.hbm [shape: bf16[256,128], index: 3, kind: input, shape index: {}]   ;;  %s1809_s4 = inlined_call_operand.vmem [shape: f32[1,128], index: 4, kind: input, shape index: {}]   ;;  %s1810_s5 = inlined_call_operand.hbm [shape: bf16[128,128], index: 5, kind: input, shape index: {}]   ;;  %s1811_s6 = inlined_call_operand.vmem [shape: f32[1,128], index: 6, kind: input, shape index: {}]   ;;  %s1812_s7 = inlined_call_operand.hbm [shape: bf16[128,128], index: 7, kind: input, shape index: {}]   ;;  %s1813_s8 = inlined_call_operand.vmem [shape: f32[1,128], index: 8, kind: input, shape index: {}]   ;;  %s1814_s9 = inlined_call_operand.hbm [shape: f32[8,128], index: 9, kind: output, shape index: {}]  }
   0x1   :  { %15 = vsyncpa [#allocation6], 0 }
   0x2   :  { %16 = vsyncpa [#allocation9], 0 }
   0x3   :  { %17 = vsyncpa [#allocation4], 0  ;;  %s1629_s30 = smov [#allocation5]   ;;  %s1489_s13 = scalar_lea.hbm %s1806_s1, 9600 }
   0x4   :  { %s33_s10 = sshll.u32 %s1629_s30, 4  ;;  %p1490_p0 = scmp.ne.s32.totalorder %s1806_s1, %s1489_s13  ;;  %s34_s10 = int_to_ptr.vmem [resolvable:$true] %s33_s10 }
   0x5   :  { %p1493_p1 = scmp.lt.u32.totalorder %s1489_s13, %s1806_s1 }
   0x7   :  { %p1495_p2 = pnand %p1493_p1, %p1490_p0 }
   0x9   :  { %1498 = shalt.err (!%p1495_p2)
}
   0xa   :  { %s1499_s18 = scalar_lea.vmem %s34_s10, 9600  ;;  %p1504_p4 = scmp.lt.s32.totalorder %s34_s10, %s34_s10 }
   0xb   :  { %p1500_p3 = scmp.ne.s32.totalorder %s34_s10, %s1499_s18  ;;  %p1505_p5 = scmp.lt.s32.totalorder %s1499_s18, %s1499_s18 }
   0xd   :  { %p1506_p6 = por %p1505_p5, %p1504_p4 }
   0xf   :  { %p1507_p7 = pnand %p1506_p6, %p1500_p3 }
  0x11   :  { %1510 = shalt.err (!%p1507_p7)
}
  0x12   :  { %s1630_s19 = smov 128   ;;  %s1631_s20 = smov 8  }
  0x13   :  { %39 = dma.hbm_to_vmem [thread:$0]  %s1806_s1, 9600, %s34_s10, [#allocation6], %s1630_s19, %s1630_s19, %s1631_s20  }
  0x14   :  { %s1632_s23 = smov [#allocation8]   ;;  %s1633_s25 = smov [#allocation2]  }
  0x15   :  { %s61_s24 = sshll.u32 %s1632_s23, 4  ;;  %s24_s26 = sshll.u32 %s1633_s25, 4  ;;  %s62_s24 = int_to_ptr.vmem [resolvable:$true] %s61_s24  ;;  %s25_s26 = int_to_ptr.vmem [resolvable:$true] %s24_s26 }
  0x16   :  { %s1511_s29 = scalar_lea.hbm %s1810_s5, 1024 }
  0x17   :  { %p1512_p8 = scmp.ne.s32.totalorder %s1810_s5, %s1511_s29  ;;  %p1515_p9 = scmp.lt.u32.totalorder %s1511_s29, %s1810_s5 }
  0x19   :  { %p1517_p10 = pnand %p1515_p9, %p1512_p8 }
  0x1b   :  { %1520 = shalt.err (!%p1517_p10)
}
  0x1c   :  { %s1521_s1 = scalar_lea.vmem %s62_s24, 1024  ;;  %p1526_p12 = scmp.lt.s32.totalorder %s62_s24, %s62_s24 }
  0x1d   :  { %p1522_p11 = scmp.ne.s32.totalorder %s62_s24, %s1521_s1  ;;  %p1527_p13 = scmp.lt.s32.totalorder %s1521_s1, %s1521_s1 }
  0x1f   :  { %p1528_p0 = por %p1527_p13, %p1526_p12 }
  0x21   :  { %p1529_p1 = pnand %p1528_p0, %p1522_p11 }
  0x23   :  { %1532 = shalt.err (!%p1529_p1)
}
  0x24   :  { %s1634_s10 = smov 64   ;;  %s1635_s14 = smov 4  }
  0x25   :  { %67 = dma.hbm_to_vmem [thread:$0]  %s1810_s5, 1024, %s62_s24, [#allocation9], %s1634_s10, %s1634_s10, %s1635_s14  }
  0x26   :  { %s1533_s19 = scalar_lea.hbm %s1805_s0, 640 }
  0x27   :  { %p1534_p2 = scmp.ne.s32.totalorder %s1805_s0, %s1533_s19  ;;  %p1537_p3 = scmp.lt.u32.totalorder %s1533_s19, %s1805_s0 }
  0x29   :  { %p1539_p4 = pnand %p1537_p3, %p1534_p2 }
  0x2b   :  { %1542 = shalt.err (!%p1539_p4)
}
  0x2c   :  { %s1543_s25 = scalar_lea.vmem %s25_s26, 640  ;;  %p1548_p6 = scmp.lt.s32.totalorder %s25_s26, %s25_s26 }
  0x2d   :  { %p1544_p5 = scmp.ne.s32.totalorder %s25_s26, %s1543_s25  ;;  %p1549_p7 = scmp.lt.s32.totalorder %s1543_s25, %s1543_s25 }
  0x2f   :  { %p1550_p8 = por %p1549_p7, %p1548_p6 }
  0x31   :  { %p1551_p9 = pnand %p1550_p8, %p1544_p5 }
  0x33   :  { %1554 = shalt.err (!%p1551_p9)
}
  0x34   :  { %27 = dma.hbm_to_vmem [thread:$0]  %s1805_s0, 640, %s25_s26, [#allocation3]  }
  0x35   :  { %s1636_s27 = smov [#allocation7]   ;;  %s1637_s29 = smov [#allocation10]  }
  0x36   :  { %s47_s28 = sshll.u32 %s1636_s27, 4  ;;  %s75_s30 = sshll.u32 %s1637_s29, 4  ;;  %s48_s28 = int_to_ptr.vmem [resolvable:$true] %s47_s28  ;;  %s76_s30 = int_to_ptr.vmem [resolvable:$true] %s75_s30 }
  0x37   :  { %s1555_s13 = scalar_lea.hbm %s1808_s3, 2048 }
  0x38   :  { %p1556_p10 = scmp.ne.s32.totalorder %s1808_s3, %s1555_s13  ;;  %p1559_p11 = scmp.lt.u32.totalorder %s1555_s13, %s1808_s3 }
  0x3a   :  { %p1561_p12 = pnand %p1559_p11, %p1556_p10 }
  0x3c   :  { %1564 = shalt.err (!%p1561_p12)
}
  0x3d   :  { %s1565_s0 = scalar_lea.vmem %s48_s28, 2048  ;;  %p1570_p0 = scmp.lt.s32.totalorder %s48_s28, %s48_s28 }
  0x3e   :  { %p1566_p13 = scmp.ne.s32.totalorder %s48_s28, %s1565_s0  ;;  %p1571_p1 = scmp.lt.s32.totalorder %s1565_s0, %s1565_s0 }
  0x40   :  { %p1572_p2 = por %p1571_p1, %p1570_p0 }
  0x42   :  { %p1573_p3 = pnand %p1572_p2, %p1566_p13 }
  0x44   :  { %1576 = shalt.err (!%p1573_p3)
}
  0x45   :  { %53 = dma.hbm_to_vmem [thread:$0]  %s1808_s3, 2048, %s48_s28, [#allocation6], %s1634_s10, %s1634_s10, %s1635_s14  }
  0x46   :  { %s1577_s21 = scalar_lea.hbm %s1812_s7, 1024 }
  0x47   :  { %p1578_p4 = scmp.ne.s32.totalorder %s1812_s7, %s1577_s21  ;;  %p1581_p5 = scmp.lt.u32.totalorder %s1577_s21, %s1812_s7 }
  0x49   :  { %p1583_p6 = pnand %p1581_p5, %p1578_p4 }
  0x4b   :  { %1586 = shalt.err (!%p1583_p6)
}
  0x4c   :  { %s1587_s24 = scalar_lea.vmem %s76_s30, 1024  ;;  %p1592_p8 = scmp.lt.s32.totalorder %s76_s30, %s76_s30 }
  0x4d   :  { %p1588_p7 = scmp.ne.s32.totalorder %s76_s30, %s1587_s24  ;;  %p1593_p9 = scmp.lt.s32.totalorder %s1587_s24, %s1587_s24 }
  0x4f   :  { %p1594_p10 = por %p1593_p9, %p1592_p8 }
  0x51   :  { %p1595_p11 = pnand %p1594_p10, %p1588_p7 }
  0x53   :  { %1598 = shalt.err (!%p1595_p11)
}
  0x54   :  { %81 = dma.hbm_to_vmem [thread:$0]  %s1812_s7, 1024, %s76_s30, [#allocation9], %s1634_s10, %s1634_s10, %s1635_s14  }
  0x55   :  { %1621 = dma.done.wait [#allocation3], 640  }
  0x56   :  { %1622 = vsyncadd [#allocation3], 4294966656 }
  0x57   :  { %1623 = dma.done.wait [#allocation6], 11648  }
  0x58   :  { %1624 = vsyncadd [#allocation6], 4294955648 }
  0x59   :  { %1625 = dma.done.wait [#allocation9], 2048  }
  0x5a   :  { %1626 = vsyncadd [#allocation9], 4294965248  ;;  %v1344_v0 = vld [vmem:[#allocation5 + $0x4] ss:$8 sps:$4 sm:$0xff]   ;;  %v1638_v1 = vmov 0   ;;  %v184_v39 = vld [vmem:[#allocation5 + $0x250] sm:$0xff] }
  0x5b   :  { %697 = vmatprep.mubr.bf16.mxu1 %v1638_v1  ;;  %v1346_v2 = vld [vmem:[#allocation5] ss:$8 sps:$4 sm:$0xff]   ;;  %583 = vmatprep.subr.bf16.mxu0 %v1344_v0  ;;  %v1347_v3 = vld [vmem:[#allocation5 + $0x14] ss:$8 sps:$4 sm:$0xff]   ;;  %v1349_v4 = vld [vmem:[#allocation5 + $0x10] ss:$8 sps:$4 sm:$0xff]   ;;  %v1205_v43 = vcombine.high %v184_v39, %v184_v39  ;;  %v1204_v44 = vcombine.low %v184_v39, %v184_v39 }
  0x5c   :  { %584 = vmatpush1.bf16.msra.mxu0 %v1346_v2  ;;  %v1350_v5 = vld [vmem:[#allocation5 + $0x24] ss:$8 sps:$4 sm:$0xff]   ;;  %v1352_v6 = vld [vmem:[#allocation5 + $0x20] ss:$8 sps:$4 sm:$0xff]   ;;  %v1353_v7 = vld [vmem:[#allocation5 + $0x34] ss:$8 sps:$4 sm:$0xff]  }
  0x5d   :  { %585 = vmatprep.subr.bf16.mxu0 %v1347_v3  ;;  %v1355_v8 = vld [vmem:[#allocation5 + $0x30] ss:$8 sps:$4 sm:$0xff]   ;;  %v1356_v9 = vld [vmem:[#allocation5 + $0x44] ss:$8 sps:$4 sm:$0xff]   ;;  %v1358_v10 = vld [vmem:[#allocation5 + $0x40] ss:$8 sps:$4 sm:$0xff]  }
  0x5e   :  { %v1359_v11 = vld [vmem:[#allocation5 + $0x54] ss:$8 sps:$4 sm:$0xff]   ;;  %v1361_v12 = vld [vmem:[#allocation5 + $0x50] ss:$8 sps:$4 sm:$0xff]   ;;  %v1362_v13 = vld [vmem:[#allocation5 + $0x64] ss:$8 sps:$4 sm:$0xff]  }
  0x5f   :  { %v101_v14 = vld [vmem:[#allocation2 + $0x8] sm:$0xff]  ;;  %v1365_v17 = vld [vmem:[#allocation5 + $0x74] ss:$8 sps:$4 sm:$0xff]   ;;  %v1367_v18 = vld [vmem:[#allocation5 + $0x70] ss:$8 sps:$4 sm:$0xff]   ;;  %vm576_vm0 = vcmask 1043456  }
  0x60   :  { %586 = vmatpush1.bf16.msra.mxu0 %v1349_v4  ;;  %v106_v15 = vpack.c.bf16 %v101_v14, %v101_v14  ;;  %v1364_v16 = vld [vmem:[#allocation5 + $0x60] ss:$8 sps:$4 sm:$0xff]   ;;  %v1368_v19 = vld [vmem:[#allocation5 + $0x84] ss:$8 sps:$4 sm:$0xff]   ;;  %v1371_v21 = vld [vmem:[#allocation5 + $0x94] ss:$8 sps:$4 sm:$0xff]  }
  0x61   :  { %587 = vmatprep.subr.bf16.mxu0 %v1350_v5  ;;  %v1370_v20 = vld [vmem:[#allocation5 + $0x80] ss:$8 sps:$4 sm:$0xff]   ;;  %v1373_v22 = vld [vmem:[#allocation5 + $0x90] ss:$8 sps:$4 sm:$0xff]   ;;  %v1374_v23 = vld [vmem:[#allocation5 + $0xa4] ss:$8 sps:$4 sm:$0xff]  }
  0x62   :  { %615 = vmatprep.mubr.bf16.mxu0 %v106_v15  ;;  %v1422_v24 = vld [vmem:[#allocation5 + $0x204] ss:$8 sps:$4 sm:$0xff]   ;;  %v1427_v25 = vld [vmem:[#allocation5 + $0x200] ss:$8 sps:$4 sm:$0xff]   ;;  %v1428_v26 = vld [vmem:[#allocation5 + $0x214] ss:$8 sps:$4 sm:$0xff]  }
  0x63   :  { %665 = vmatprep.subr.bf16.mxu1 %v1422_v24  ;;  %v1376_v27 = vld [vmem:[#allocation5 + $0xa0] ss:$8 sps:$4 sm:$0xff]   ;;  %v1377_v28 = vld [vmem:[#allocation5 + $0xb4] ss:$8 sps:$4 sm:$0xff]   ;;  %v1433_v29 = vld [vmem:[#allocation5 + $0x210] ss:$8 sps:$4 sm:$0xff]  }
  0x64   :  { %588 = vmatpush1.bf16.msra.mxu0 %v1352_v6  ;;  %666 = vmatpush1.bf16.msra.mxu1 %v1427_v25  ;;  %v1434_v30 = vld [vmem:[#allocation5 + $0x224] ss:$8 sps:$4 sm:$0xff]   ;;  %v1379_v31 = vld [vmem:[#allocation5 + $0xb0] ss:$8 sps:$4 sm:$0xff]   ;;  %v1439_v33 = vld [vmem:[#allocation5 + $0x220] ss:$8 sps:$4 sm:$0xff]  }
  0x65   :  { %589 = vmatprep.subr.bf16.mxu0 %v1353_v7  ;;  %667 = vmatprep.subr.bf16.mxu1 %v1428_v26  ;;  %v1380_v32 = vld [vmem:[#allocation5 + $0xc4] ss:$8 sps:$4 sm:$0xff]   ;;  %v1440_v34 = vld [vmem:[#allocation5 + $0x234] ss:$8 sps:$4 sm:$0xff]   ;;  %v1382_v35 = vld [vmem:[#allocation5 + $0xc0] ss:$8 sps:$4 sm:$0xff]  }
  0x66   :  { %v1445_v36 = vld [vmem:[#allocation5 + $0x230] ss:$8 sps:$4 sm:$0xff]   ;;  %v1383_v37 = vld [vmem:[#allocation5 + $0xd4] ss:$8 sps:$4 sm:$0xff]   ;;  %v1446_v38 = vld [vmem:[#allocation5 + $0x244] ss:$8 sps:$4 sm:$0xff]  }
  0x67   :  { %v1385_v40 = vld [vmem:[#allocation5 + $0xd0] ss:$8 sps:$4 sm:$0xff]   ;;  %v1451_v41 = vld [vmem:[#allocation5 + $0x240] ss:$8 sps:$4 sm:$0xff]   ;;  %v1386_v42 = vld [vmem:[#allocation5 + $0xe4] ss:$8 sps:$4 sm:$0xff]  }
  0x68   :  { %590 = vmatpush1.bf16.msra.mxu0 %v1355_v8  ;;  %668 = vmatpush1.bf16.msra.mxu1 %v1433_v29  ;;  %v1388_v45 = vld [vmem:[#allocation5 + $0xe0] ss:$8 sps:$4 sm:$0xff]   ;;  %v1389_v46 = vld [vmem:[#allocation5 + $0xf4] ss:$8 sps:$4 sm:$0xff]   ;;  %v578_v48 = vsel %vm576_vm0, %v1204_v44, 0  ;;  %vm572_vm1 = vcmask 719872  }
  0x69   :  { %591 = vmatprep.subr.bf16.mxu0 %v1356_v9  ;;  %669 = vmatprep.subr.bf16.mxu1 %v1434_v30  ;;  %v104_v47 = vld [vmem:[#allocation2 + $0x20] sm:$0xff]  ;;  %v1394_v52 = vld [vmem:[#allocation5 + $0x104] ss:$8 sps:$4 sm:$0xff]   ;;  %v103_v53 = vld [vmem:[#allocation2 + $0x18] sm:$0xff]  ;;  %vm1640_vm2 = vmmov 0   ;;  %s1641_s11 = smov [#allocation11]  }
  0x6a   :  { %v1457_v49 = vld [vmem:[#allocation7 + $0x40] sm:$0xff]   ;;  %v109_v54 = vpack.c.bf16 %v104_v47, %v104_v47  ;;  %v1459_v56 = vld [vmem:[#allocation7 + $0x48] sm:$0xff]   ;;  %v108_v61 = vpack.c.bf16 %v103_v53, %v103_v53  ;;  %v1461_v62 = vld [vmem:[#allocation7 + $0x50] sm:$0xff]   ;;  %s1119_s12 = sshll.u32 %s1641_s11, 4  ;;  %s1120_s12 = int_to_ptr.vmem [resolvable:$true] %s1119_s12 }
  0x6b   :  { %v1391_v50 = vld [vmem:[#allocation5 + $0xf0] ss:$8 sps:$4 sm:$0xff]   ;;  %v1392_v57 = vld [vmem:[#allocation5 + $0x100] ss:$8 sps:$4 sm:$0xff]   ;;  %v1397_v59 = vld [vmem:[#allocation5 + $0x114] ss:$8 sps:$4 sm:$0xff]   ;;  %p1604_p13 = scmp.lt.s32.totalorder %s1120_s12, %s1120_s12 }
  0x6c   :  { %592 = vmatpush1.bf16.msra.mxu0 %v1358_v10  ;;  %670 = vmatpush1.bf16.msra.mxu1 %v1439_v33  ;;  %v100_v51 = vld [vmem:[#allocation2] sm:$0xff]  ;;  %v1460_v60 = vld [vmem:[#allocation7 + $0x8] sm:$0xff]   ;;  %v1462_v1 = vld [vmem:[#allocation7 + $0x10] sm:$0xff]  }
  0x6d   :  { %593 = vmatprep.subr.bf16.mxu0 %v1359_v11  ;;  %671 = vmatprep.subr.bf16.mxu1 %v1440_v34  ;;  %v1458_v55 = vld [vmem:[#allocation7] sm:$0xff]   ;;  %v105_v58 = vpack.c.bf16 %v100_v51, %v100_v51  ;;  %v1400_v0 = vld [vmem:[#allocation5 + $0x124] ss:$8 sps:$4 sm:$0xff]   ;;  %v1463_v2 = vld [vmem:[#allocation7 + $0x58] sm:$0xff]  }
  0x6e   :  { %v1395_v63 = vld [vmem:[#allocation5 + $0x110] ss:$8 sps:$4 sm:$0xff]   ;;  %v1398_v3 = vld [vmem:[#allocation5 + $0x120] ss:$8 sps:$4 sm:$0xff]   ;;  %v1403_v4 = vld [vmem:[#allocation5 + $0x134] ss:$8 sps:$4 sm:$0xff]  }
  0x6f   :  { %v1464_v5 = vld [vmem:[#allocation7 + $0x18] sm:$0xff]   ;;  %v1465_v6 = vld [vmem:[#allocation7 + $0x60] sm:$0xff]   ;;  %v1406_v8 = vld [vmem:[#allocation5 + $0x144] ss:$8 sps:$4 sm:$0xff]  }
  0x70   :  { %594 = vmatpush1.bf16.msra.mxu0 %v1361_v12  ;;  %672 = vmatpush1.bf16.msra.mxu1 %v1445_v36  ;;  %v1401_v7 = vld [vmem:[#allocation5 + $0x130] ss:$8 sps:$4 sm:$0xff]   ;;  %v1404_v10 = vld [vmem:[#allocation5 + $0x140] ss:$8 sps:$4 sm:$0xff]   ;;  %v1409_v11 = vld [vmem:[#allocation5 + $0x154] ss:$8 sps:$4 sm:$0xff]  }
  0x71   :  { %595 = vmatprep.subr.bf16.mxu0 %v1362_v13  ;;  %673 = vmatprep.subr.bf16.mxu1 %v1446_v38  ;;  %v1466_v9 = vld [vmem:[#allocation7 + $0x20] sm:$0xff]   ;;  %v1412_v13 = vld [vmem:[#allocation5 + $0x164] ss:$8 sps:$4 sm:$0xff]   ;;  %v1410_v14 = vld [vmem:[#allocation5 + $0x160] ss:$8 sps:$4 sm:$0xff]  }
  0x72   :  { %v1407_v12 = vld [vmem:[#allocation5 + $0x150] ss:$8 sps:$4 sm:$0xff]   ;;  %v1415_v15 = vld [vmem:[#allocation5 + $0x174] ss:$8 sps:$4 sm:$0xff]   ;;  %v1438_v25 = vld [vmem:[#allocation5 + $0x1c4] ss:$8 sps:$4 sm:$0xff]  }
  0x73   :  { %v1430_v24 = vld [vmem:[#allocation5 + $0x1b0] ss:$8 sps:$4 sm:$0xff]   ;;  %v1436_v26 = vld [vmem:[#allocation5 + $0x1c0] ss:$8 sps:$4 sm:$0xff]   ;;  %v1450_v29 = vld [vmem:[#allocation5 + $0x1e4] ss:$8 sps:$4 sm:$0xff]  }
  0x74   :  { %596 = vmatpush1.bf16.msra.mxu0 %v1364_v16  ;;  %674 = vmatpush1.bf16.msra.mxu1 %v1451_v41  ;;  %v1413_v16 = vld [vmem:[#allocation5 + $0x170] ss:$8 sps:$4 sm:$0xff]   ;;  %v1448_v30 = vld [vmem:[#allocation5 + $0x1e0] ss:$8 sps:$4 sm:$0xff]   ;;  %v1639_v41 = vmov 0.0  }
  0x75   :  { %597 = vmatprep.subr.bf16.mxu0 %v1365_v17  ;;  %1206 = vmatprep.subr.msk.bf16.mxu1 %vm576_vm0, %v1205_v43  ;;  %v1418_v17 = vld [vmem:[#allocation5 + $0x184] ss:$8 sps:$4 sm:$0xff]   ;;  %v1471_v39 = vld [vmem:[#allocation7 + $0x78] sm:$0xff]  }
  0x76   :  { %v102_v33 = vld [vmem:[#allocation2 + $0x10] sm:$0xff]  ;;  %v1468_v36 = vld [vmem:[#allocation7 + $0x28] sm:$0xff]  }
  0x77   :  { %v107_v34 = vpack.c.bf16 %v102_v33, %v102_v33  ;;  %v1470_v38 = vld [vmem:[#allocation7 + $0x30] sm:$0xff]  }
  0x78   :  { %598 = vmatpush1.bf16.msra.mxu0 %v1367_v18  ;;  %676 = vmatpush1.bf16.msra.mxu1 %v578_v48  ;;  %v1416_v18 = vld [vmem:[#allocation5 + $0x180] ss:$8 sps:$4 sm:$0xff]  }
  0x79   :  { %599 = vmatprep.subr.bf16.mxu0 %v1368_v19  ;;  %1243 = vmatprep.subr.bf16.mxu1 %v1457_v49  ;;  %v1421_v19 = vld [vmem:[#allocation5 + $0x194] ss:$8 sps:$4 sm:$0xff]   ;;  %v185_v49 = vld [vmem:[%s1807_s2] sm:$0x3] }
  0x7b   :  { %1207 = vmatmul.mubr.msk.bf16.vlgmr.msra.gmra.mrb[0].mxu1 %vm572_vm1, %v109_v54 }
  0x7c   :  { %600 = vmatpush1.bf16.msra.mxu0 %v1370_v20  ;;  %1244 = vmatpush3.bf16.msra.mxu1 %v1458_v55  ;;  %v1419_v20 = vld [vmem:[#allocation5 + $0x190] ss:$8 sps:$4 sm:$0xff]  }
  0x7d   :  { %601 = vmatprep.subr.bf16.mxu0 %v1371_v21  ;;  %1245 = vmatprep.subr.bf16.mxu1 %v1459_v56  ;;  %v1426_v21 = vld [vmem:[#allocation5 + $0x1a4] ss:$8 sps:$4 sm:$0xff]  }
  0x80   :  { %602 = vmatpush1.bf16.msra.mxu0 %v1373_v22  ;;  %1246 = vmatpush3.bf16.msra.mxu1 %v1460_v60  ;;  %v1424_v22 = vld [vmem:[#allocation5 + $0x1a0] ss:$8 sps:$4 sm:$0xff]  }
  0x81   :  { %603 = vmatprep.subr.bf16.mxu0 %v1374_v23  ;;  %1247 = vmatprep.subr.bf16.mxu1 %v1461_v62  ;;  %v1432_v23 = vld [vmem:[#allocation5 + $0x1b4] ss:$8 sps:$4 sm:$0xff]  }
  0x84   :  { %604 = vmatpush1.bf16.msra.mxu0 %v1376_v27  ;;  %1248 = vmatpush3.bf16.msra.mxu1 %v1462_v1  ;;  %v1444_v27 = vld [vmem:[#allocation5 + $0x1d4] ss:$8 sps:$4 sm:$0xff]  }
  0x85   :  { %605 = vmatprep.subr.bf16.mxu0 %v1377_v28  ;;  %1249 = vmatprep.subr.bf16.mxu1 %v1463_v2  ;;  %v1442_v28 = vld [vmem:[#allocation5 + $0x1d0] ss:$8 sps:$4 sm:$0xff]   ;;  %v1474_v2 = vld [vmem:[#allocation8 + $0x8] sm:$0xff]  }
  0x88   :  { %606 = vmatpush1.bf16.msra.mxu0 %v1379_v31  ;;  %1250 = vmatpush3.bf16.msra.mxu1 %v1464_v5  ;;  %v1455_v31 = vld [vmem:[#allocation5 + $0x1f4] ss:$8 sps:$4 sm:$0xff]  }
  0x89   :  { %607 = vmatprep.subr.bf16.mxu0 %v1380_v32  ;;  %1251 = vmatprep.subr.bf16.mxu1 %v1465_v6  ;;  %v1453_v32 = vld [vmem:[#allocation5 + $0x1f0] ss:$8 sps:$4 sm:$0xff]   ;;  %v1478_v6 = vld [vmem:[#allocation8 + $0x28] sm:$0xff]  }
  0x8a   :  { %v1477_v5 = vld [vmem:[#allocation8 + $0x20] sm:$0xff]  }
  0x8c   :  { %608 = vmatpush1.bf16.msra.mxu0 %v1382_v35  ;;  %1252 = vmatpush3.bf16.msra.mxu1 %v1466_v9  ;;  %v1467_v35 = vld [vmem:[#allocation7 + $0x68] sm:$0xff]  }
  0x8d   :  { %609 = vmatprep.subr.bf16.mxu0 %v1383_v37  ;;  %1253 = vmatprep.subr.bf16.mxu1 %v1467_v35  ;;  %v1469_v37 = vld [vmem:[#allocation7 + $0x70] sm:$0xff]  }
  0x90   :  { %610 = vmatpush1.bf16.msra.mxu0 %v1385_v40  ;;  %1254 = vmatpush3.bf16.msra.mxu1 %v1468_v36  ;;  %v1472_v40 = vld [vmem:[#allocation7 + $0x38] sm:$0xff]  }
  0x91   :  { %611 = vmatprep.subr.bf16.mxu0 %v1386_v42  ;;  %1255 = vmatprep.subr.bf16.mxu1 %v1469_v37 }
  0x94   :  { %612 = vmatpush1.bf16.msra.mxu0 %v1388_v45  ;;  %1256 = vmatpush3.bf16.msra.mxu1 %v1470_v38 }
  0x95   :  { %613 = vmatprep.subr.bf16.mxu0 %v1389_v46  ;;  %1257 = vmatprep.subr.bf16.mxu1 %v1471_v39  ;;  %v187_v46 = vlaneseq }
  0x97   :  { %v188_v47 = vshrl.u32 %v187_v46, 7 }
  0x98   :  { %614 = vmatpush1.bf16.msra.mxu0 %v1391_v50  ;;  %1258 = vmatpush3.bf16.msra.mxu1 %v1472_v40 }
  0x99   :  { %624 = vmatprep.subr.bf16.mxu0 %v1394_v52  ;;  %1283 = vmatprep.subr.bf16.mxu1 %v1639_v41  ;;  %v189_v48 = vsub.s32 0, %v188_v47  ;;  %v193_v50 = vsub.s32 1, %v188_v47 }
  0x9b   :  { %616 = vmatmul.mubr.bf16.vlgmr.msra.gmra.mrb[0].mxu0 %v105_v58  ;;  %v190_v51 = vrot.slane %v185_v49, %v189_v48  ;;  %v194_v52 = vrot.slane %v185_v49, %v193_v50 }
  0x9c   :  { %625 = vmatpush1.bf16.msra.mxu0 %v1392_v57  ;;  %656 = vmatprep.mubr.bf16.mxu0 %v108_v61 }
  0x9d   :  { %626 = vmatprep.subr.bf16.mxu0 %v1397_v59 }
  0xa0   :  { %627 = vmatpush1.bf16.msra.mxu0 %v1395_v63 }
  0xa1   :  { %628 = vmatprep.subr.bf16.mxu0 %v1400_v0  ;;  %v1473_v0 = vld [vmem:[#allocation8] sm:$0xff]  }
  0xa4   :  { %629 = vmatpush1.bf16.msra.mxu0 %v1398_v3  ;;  %v1475_v3 = vld [vmem:[#allocation8 + $0x10] sm:$0xff]  }
  0xa5   :  { %630 = vmatprep.subr.bf16.mxu0 %v1403_v4  ;;  %v1476_v4 = vld [vmem:[#allocation8 + $0x18] sm:$0xff]  }
  0xa8   :  { %631 = vmatpush1.bf16.msra.mxu0 %v1401_v7  ;;  %v1479_v7 = vld [vmem:[#allocation8 + $0x30] sm:$0xff]  }
  0xa9   :  { %632 = vmatprep.subr.bf16.mxu0 %v1406_v8  ;;  %v1480_v8 = vld [vmem:[#allocation8 + $0x38] sm:$0xff]  }
  0xac   :  { %633 = vmatpush1.bf16.msra.mxu0 %v1404_v10  ;;  %v1208_v10 = vld [vmem:[%s1809_s4] ss:$0 sm:$0xff] }
  0xad   :  { %634 = vmatprep.subr.bf16.mxu0 %v1409_v11 }
  0xb0   :  { %635 = vmatpush1.bf16.msra.mxu0 %v1407_v12 }
  0xb1   :  { %636 = vmatprep.subr.bf16.mxu0 %v1412_v13 }
  0xb4   :  { %637 = vmatpush1.bf16.msra.mxu0 %v1410_v14 }
  0xb5   :  { %638 = vmatprep.subr.bf16.mxu0 %v1415_v15 }
  0xb8   :  { %639 = vmatpush1.bf16.msra.mxu0 %v1413_v16 }
  0xb9   :  { %640 = vmatprep.subr.bf16.mxu0 %v1418_v17  ;;  %v1481_v17 = vld [vmem:[#allocation10] sm:$0xff]  }
  0xbc   :  { %641 = vmatpush1.bf16.msra.mxu0 %v1416_v18 }
  0xbd   :  { %642 = vmatprep.subr.bf16.mxu0 %v1421_v19  ;;  %v1482_v19 = vld [vmem:[#allocation10 + $0x8] sm:$0xff]  }
  0xc0   :  { %643 = vmatpush1.bf16.msra.mxu0 %v1419_v20  ;;  %v1483_v20 = vld [vmem:[#allocation10 + $0x10] sm:$0xff]  }
  0xc1   :  { %644 = vmatprep.subr.bf16.mxu0 %v1426_v21  ;;  %v1484_v21 = vld [vmem:[#allocation10 + $0x18] sm:$0xff]  }
  0xc4   :  { %645 = vmatpush1.bf16.msra.mxu0 %v1424_v22  ;;  %v1485_v22 = vld [vmem:[#allocation10 + $0x20] sm:$0xff]  }
  0xc5   :  { %646 = vmatprep.subr.bf16.mxu0 %v1432_v23  ;;  %v1486_v23 = vld [vmem:[#allocation10 + $0x28] sm:$0xff]  }
  0xc8   :  { %647 = vmatpush1.bf16.msra.mxu0 %v1430_v24  ;;  %v1487_v24 = vld [vmem:[#allocation10 + $0x30] sm:$0xff]  }
  0xc9   :  { %648 = vmatprep.subr.bf16.mxu0 %v1438_v25  ;;  %v1488_v25 = vld [vmem:[#allocation10 + $0x38] sm:$0xff]  }
  0xcc   :  { %649 = vmatpush1.bf16.msra.mxu0 %v1436_v26  ;;  %v1225_v26 = vld [vmem:[%s1811_s6] ss:$0 sm:$0xff]  ;;  %s1599_s6 = scalar_lea.vmem %s1120_s12, 128 }
  0xcd   :  { %650 = vmatprep.subr.bf16.mxu0 %v1444_v27  ;;  %p1600_p12 = scmp.ne.s32.totalorder %s1120_s12, %s1599_s6  ;;  %p1605_p0 = scmp.lt.s32.totalorder %s1599_s6, %s1599_s6 }
  0xcf   :  { %p1606_p1 = por %p1605_p0, %p1604_p13 }
  0xd0   :  { %651 = vmatpush1.bf16.msra.mxu0 %v1442_v28 }
  0xd1   :  { %652 = vmatprep.subr.bf16.mxu0 %v1450_v29  ;;  %p1607_p2 = pnand %p1606_p1, %p1600_p12 }
  0xd4   :  { %653 = vmatpush1.bf16.msra.mxu0 %v1448_v30 }
  0xd5   :  { %654 = vmatprep.subr.bf16.mxu0 %v1455_v31 }
  0xd8   :  { %655 = vmatpush1.bf16.msra.mxu0 %v1453_v32 }
  0xdb   :  { %657 = vmatmul.mubr.bf16.vlgmr.msra.gmra.mrb[0].mxu0 %v107_v34  ;;  %v1234_v34 = vld [vmem:[%s1813_s8] ss:$0 sm:$0xff] }
 0x14e   :  { %v699_v42 = vpop.f32.mrb[0].mxu1 }
 0x14f   :  { %v701_v43 = vpop.f32.mrb[1].mxu1 }
 0x150   :  { %v703_v44 = vpop.f32.mrb[2].mxu1 }
 0x151   :  { %v704_v45 = vpop.f32.mrb[3].mxu1 }
 0x1ae   :  { %v658_v53 = vpop.f32.mrb[0].mxu0 }
 0x1af   :  { %v1323_v54 = vadd.f32 %v658_v53, %v190_v51  ;;  %v660_v55 = vpop.f32.mrb[1].mxu0 }
 0x1b0   :  { %v1325_v56 = vadd.f32 %v660_v55, %v194_v52  ;;  %v662_v57 = vpop.f32.mrb[2].mxu0 }
 0x1b1   :  { %v1324_v58 = vadd.f32 %v1323_v54, %v699_v42  ;;  %v663_v59 = vpop.f32.mrb[3].mxu0 }
 0x1b2   :  { %v1326_v60 = vadd.f32 %v1325_v56, %v701_v43 }
 0x1b3   :  { %v706_v61 = vmax.f32 %v1324_v58, 0.0 }
 0x1b4   :  { %v707_v62 = vmax.f32 %v1326_v60, 0.0 }
 0x1b5   :  { %v708_v1 = vpack.c.bf16 %v706_v61, %v706_v61 }
 0x1b6   :  { %v709_v63 = vpack.c.bf16 %v707_v62, %v707_v62 }
 0x1b8   :  { %877 = vmatprep.mubr.bf16.mxu1 %v709_v63 }
 0x1b9   :  { %878 = vmatmul.mubr.bf16.vlgmr.msra.gmra.mrb[4].mxu1 %v708_v1 }
 0x1ba   :  { %1284 = vmatpush3.bf16.msra.mxu1 %v1473_v0  ;;  %1299 = vmatprep.mubr.msk.bf16.mxu1 %vm1640_vm2, %v1639_v41 }
 0x1bb   :  { %1285 = vmatprep.subr.bf16.mxu1 %v1639_v41 }
 0x1be   :  { %1286 = vmatpush3.bf16.msra.mxu1 %v1474_v2 }
 0x1bf   :  { %1287 = vmatprep.subr.bf16.mxu1 %v1639_v41 }
 0x1c2   :  { %1288 = vmatpush3.bf16.msra.mxu1 %v1475_v3 }
 0x1c3   :  { %1289 = vmatprep.subr.bf16.mxu1 %v1639_v41 }
 0x1c6   :  { %1290 = vmatpush3.bf16.msra.mxu1 %v1476_v4 }
 0x1c7   :  { %1291 = vmatprep.subr.bf16.mxu1 %v1639_v41 }
 0x1ca   :  { %1292 = vmatpush3.bf16.msra.mxu1 %v1477_v5 }
 0x1cb   :  { %1293 = vmatprep.subr.bf16.mxu1 %v1639_v41 }
 0x1ce   :  { %1294 = vmatpush3.bf16.msra.mxu1 %v1478_v6 }
 0x1cf   :  { %1295 = vmatprep.subr.bf16.mxu1 %v1639_v41 }
 0x1d2   :  { %1296 = vmatpush3.bf16.msra.mxu1 %v1479_v7 }
 0x1d3   :  { %1297 = vmatprep.subr.bf16.mxu1 %v1639_v41 }
 0x1d6   :  { %1298 = vmatpush3.bf16.msra.mxu1 %v1480_v8 }
 0x1d7   :  { %1303 = vmatprep.subr.bf16.mxu1 %v1639_v41 }
 0x28c   :  { %v1259_v9 = vpop.f32.mrb[4].mxu1 }
 0x28d   :  { %v1260_v11 = vpop.f32.mrb[5].mxu1 }
 0x28e   :  { %v1261_v12 = vadd.f32 %v1260_v11, %v1259_v9  ;;  %v1262_v13 = vpop.f32.mrb[6].mxu1 }
 0x28f   :  { %v1263_v14 = vpop.f32.mrb[7].mxu1 }
 0x290   :  { %v880_v15 = vadd.f32 %v1261_v12, %v1208_v10 }
 0x292   :  { %v885_v16 = vmax.f32 %v880_v15, 0.0 }
 0x294   :  { %v886_v18 = vpack.c.bf16 %v885_v16, %v885_v16 }
 0x296   :  { %1300 = vmatmul.mubr.bf16.vlgmr.msra.gmra.mrb[8].mxu1 %v886_v18 }
 0x297   :  { %1304 = vmatpush3.bf16.msra.mxu1 %v1481_v17  ;;  %1319 = vmatprep.mubr.msk.bf16.mxu1 %vm1640_vm2, %v1639_v41 }
 0x298   :  { %1305 = vmatprep.subr.bf16.mxu1 %v1639_v41 }
 0x29b   :  { %1306 = vmatpush3.bf16.msra.mxu1 %v1482_v19 }
 0x29c   :  { %1307 = vmatprep.subr.bf16.mxu1 %v1639_v41 }
 0x29f   :  { %1308 = vmatpush3.bf16.msra.mxu1 %v1483_v20 }
 0x2a0   :  { %1309 = vmatprep.subr.bf16.mxu1 %v1639_v41 }
 0x2a3   :  { %1310 = vmatpush3.bf16.msra.mxu1 %v1484_v21 }
 0x2a4   :  { %1311 = vmatprep.subr.bf16.mxu1 %v1639_v41 }
 0x2a7   :  { %1312 = vmatpush3.bf16.msra.mxu1 %v1485_v22 }
 0x2a8   :  { %1313 = vmatprep.subr.bf16.mxu1 %v1639_v41 }
 0x2ab   :  { %1314 = vmatpush3.bf16.msra.mxu1 %v1486_v23 }
 0x2ac   :  { %1315 = vmatprep.subr.bf16.mxu1 %v1639_v41 }
 0x2af   :  { %1316 = vmatpush3.bf16.msra.mxu1 %v1487_v24 }
 0x2b0   :  { %1317 = vmatprep.subr.bf16.mxu1 %v1639_v41 }
 0x2b3   :  { %1318 = vmatpush3.bf16.msra.mxu1 %v1488_v25 }
 0x369   :  { %v992_v27 = vpop.f32.mrb[8].mxu1 }
 0x36a   :  { %v993_v28 = vadd.f32 %v1225_v26, %v992_v27  ;;  %v1301_v29 = vpop.f32.mrb[9].mxu1 }
 0x36b   :  { %v995_v30 = vpop.f32.mrb[10].mxu1 }
 0x36c   :  { %v998_v31 = vmax.f32 %v993_v28, 0.0  ;;  %v1302_v32 = vpop.f32.mrb[11].mxu1 }
 0x36e   :  { %v999_v33 = vpack.c.bf16 %v998_v31, %v998_v31 }
 0x370   :  { %1320 = vmatmul.mubr.bf16.vlgmr.msra.gmra.mrb[12].mxu1 %v999_v33 }
 0x443   :  { %v1105_v35 = vpop.f32.mrb[12].mxu1 }
 0x444   :  { %v1106_v36 = vadd.f32 %v1234_v34, %v1105_v35  ;;  %v1321_v37 = vpop.f32.mrb[13].mxu1 }
 0x445   :  { %v1108_v38 = vpop.f32.mrb[14].mxu1 }
 0x446   :  { %v1111_v39 = vmax.f32 %v1106_v36, 0.0  ;;  %v1322_v40 = vpop.f32.mrb[15].mxu1 }
 0x448   :  { %1112 = vst [vmem:[#allocation11] sm:$0xff] %v1111_v39 }
 0x449   :  { %1610 = shalt.err (!%p1607_p2)
}
 0x44a   :  { %s1611_s8 = scalar_lea.hbm %s1814_s9, 128 }
 0x44b   :  { %p1612_p3 = scmp.ne.s32.totalorder %s1814_s9, %s1611_s8  ;;  %p1615_p4 = scmp.lt.u32.totalorder %s1611_s8, %s1814_s9 }
 0x44d   :  { %p1617_p5 = pnand %p1615_p4, %p1612_p3 }
 0x44f   :  { %1620 = shalt.err (!%p1617_p5)
}
 0x450   :  { %1122 = dma.vmem_to_hbm [thread:$0]  %s1120_s12, 128, %s1814_s9, [#allocation4]  }
 0x451   :  { %1627 = dma.done.wait [#allocation4], 128  }
 0x452   :  { %1628 = vsyncadd [#allocation4], 4294967168 }
 0x453   :  { %1126 = vsyncpa [#allocation3], 1 }
 0x454   :  { %1127 = vsyncpa [#allocation6], 1 }
 0x455   :  { %1128 = vsyncpa [#allocation9], 1 }
 0x456   :  { %1129 = vsyncpa [#allocation4], 1 }

</bundles_post_ra>
